<compile_context>
chip_gen: v7x
topology: tpu7x:2x2x1
jax: 0.10.0
libtpu: 0.0.40
codegen_flags: <defaults>
</compile_context>

<pallas_src>
import jax
import jax.numpy as jnp
from jax.experimental import pallas as pl
from jax.experimental.pallas import tpu as pltpu


def _pos_enc_kernel(x_ref, pos_ref, out_ref):
    # x_ref: (B, Ts, D); pos_ref: (Ts, D) (leading 1 squeezed away).
    # Pure VPU elementwise add broadcast over batch; HBM-bandwidth bound.
    out_ref[...] = (x_ref[...] + pos_ref[...].astype(x_ref.dtype)).astype(out_ref.dtype)


def _round_up(v, m):
    return ((v + m - 1) // m) * m


def _pick_seq_tile(B, S, D, itemsize):
    """Pick the sequence tile so the x block is ~2 MiB.

    That keeps the double-buffered footprint (2*x + 2*out + 2*pos blocks,
    roughly 9 MiB) inside the default scoped-VMEM limit of every TPU
    generation while being large enough to amortize the fixed per-grid-step
    pipeline overhead (measured: 128-row tiles ~29% of HBM roofline vs ~85%
    at 512+ rows for a streaming f32 add).
    """
    TARGET_X_BLOCK_BYTES = 2 << 20
    if S <= 8:
        return S  # full-extent block, single step (tiny / launch-latency case)
    bytes_per_row = max(1, B * D * itemsize)
    tile = max(8, (TARGET_X_BLOCK_BYTES // bytes_per_row) // 8 * 8)
    if tile >= S:
        # Whole sequence fits in one comfortable block; split it in two so
        # both v7x TensorCores get a grid step (near-neutral on v5e/v6e).
        tile = _round_up(pl.cdiv(S, 2), 8)
    return tile


def learnable_positional_encoding(x, pos_embed, *, seq_tile=None, donate_x=False):
    """x: (B, S, D), pos_embed: (1, max_len, D) -> x + pos_embed[:, :S, :]."""
    B, S, D = x.shape
    one, max_len, Dp = pos_embed.shape
    assert one == 1 and Dp == D and max_len >= S

    itemsize = jnp.dtype(x.dtype).itemsize
    pos_itemsize = jnp.dtype(pos_embed.dtype).itemsize

    tile = seq_tile if seq_tile is not None else _pick_seq_tile(B, S, D, itemsize)
    grid = (pl.cdiv(S, tile),)

    # Generation-aware scoped-VMEM ceiling (v7x: 64 MiB physical; v5e/v6e: 128).
    try:
        vmem_cap = pltpu.get_tpu_info().vmem_capacity_bytes
    except Exception:  # pragma: no cover - conservative fallback
        vmem_cap = 64 << 20
    vmem_limit = min(vmem_cap // 2, 64 << 20)

    cost = pl.CostEstimate(
        flops=B * S * D,
        transcendentals=0,
        bytes_accessed=2 * B * S * D * itemsize + S * D * pos_itemsize,
    )

    extra_kwargs = {}
    if donate_x:
        # Caller promises x can be overwritten (e.g. donated under jit):
        # output re-uses x's buffer, removing the extra allocation/copy.
        extra_kwargs["input_output_aliases"] = {0: 0}

    return pl.pallas_call(
        _pos_enc_kernel,
        out_shape=jax.ShapeDtypeStruct((B, S, D), x.dtype),
        grid=grid,
        in_specs=[
            pl.BlockSpec((B, tile, D), lambda i: (0, i, 0)),
            # Index the (1, max_len, D) table directly: no host-side slice,
            # only the rows each grid step needs are DMA'd.
            pl.BlockSpec((pl.Squeezed(), tile, D), lambda i: (0, i, 0)),
        ],
        out_specs=pl.BlockSpec((B, tile, D), lambda i: (0, i, 0)),
        compiler_params=pltpu.CompilerParams(
            dimension_semantics=("parallel",),
            vmem_limit_bytes=vmem_limit,
        ),
        cost_estimate=cost,
        **extra_kwargs,
    )(x, pos_embed)


def reference(x, pos_embed):
    return x + pos_embed[:, : x.shape[1], :]


if __name__ == "__main__":
    root = jax.random.PRNGKey(0)
    k_x, k_p, k_x2, k_p2, k_x3, k_p3 = jax.random.split(root, 6)

    # Small shapes consistent with the module; D=128 keeps the lane axis dense.
    B, S, max_len, D = 2, 8, 16, 128
    x = jax.random.normal(k_x, (B, S, D), jnp.float32)
    pos_embed = jax.random.normal(k_p, (1, max_len, D), jnp.float32)

    out = jax.block_until_ready(learnable_positional_encoding(x, pos_embed))
    ref = reference(x, pos_embed)
    assert out.shape == (B, S, D), out.shape
    assert jnp.allclose(out, ref, atol=1e-6, rtol=1e-6), \
        float(jnp.max(jnp.abs(out - ref)))

    # Larger case: auto tile selection (~2 MiB x blocks), multi-step parallel grid.
    B2, S2, max_len2, D2 = 4, 1024, 2048, 256
    x2 = jax.random.normal(k_x2, (B2, S2, D2), jnp.float32)
    pos_embed2 = jax.random.normal(k_p2, (1, max_len2, D2), jnp.float32)

    out2 = jax.block_until_ready(learnable_positional_encoding(x2, pos_embed2))
    ref2 = reference(x2, pos_embed2)
    assert out2.shape == (B2, S2, D2), out2.shape
    assert jnp.allclose(out2, ref2, atol=1e-6, rtol=1e-6), \
        float(jnp.max(jnp.abs(out2 - ref2)))

    # Ragged case: S not divisible by the tile -> pl.cdiv grid + padded last block.
    B3, S3, max_len3, D3 = 2, 200, 256, 128
    x3 = jax.random.normal(k_x3, (B3, S3, D3), jnp.float32)
    pos_embed3 = jax.random.normal(k_p3, (1, max_len3, D3), jnp.float32)

    out3 = jax.block_until_ready(learnable_positional_encoding(x3, pos_embed3))
    ref3 = reference(x3, pos_embed3)
    assert out3.shape == (B3, S3, D3), out3.shape
    assert jnp.allclose(out3, ref3, atol=1e-6, rtol=1e-6), \
        float(jnp.max(jnp.abs(out3 - ref3)))

    # TODO(synk): for tiny shapes this op is pure dispatch latency; fuse the add
    # into the neighboring kernel (embedding lookup / first matmul) at the call
    # site instead of launching it standalone.
    print("KERNEL_OK")
</pallas_src>

<mosaic_0001>
module attributes {stable_mosaic.version = 11 : i64} {
  func.func @_pos_enc_kernel(%arg0: i32, %arg1: memref<2x8x128xf32, #tpu.memory_space<vmem>>, %arg2: memref<1x8x128xf32, #tpu.memory_space<vmem>>, %arg3: memref<2x8x128xf32, #tpu.memory_space<vmem>>) attributes {dimension_semantics = [#tpu.dimension_semantics<parallel>], iteration_bounds = array<i64: 1>, scalar_prefetch = 0 : i64, scratch_operands = 0 : i64, tpu.core_type = #tpu.core_type<tc>, window_params = [{transform_indices = @transform_0, window_bounds = array<i64: 2, 8, 128>}, {transform_indices = @transform_1, window_bounds = array<i64: 1, 8, 128>}, {transform_indices = @transform_2, window_bounds = array<i64: 2, 8, 128>}]} {
    %c0 = arith.constant 0 : index
    %c0_0 = arith.constant 0 : index
    %c0_1 = arith.constant 0 : index
    %0 = vector.load %arg1[%c0, %c0_0, %c0_1] : memref<2x8x128xf32, #tpu.memory_space<vmem>>, vector<2x8x128xf32>
    %c0_2 = arith.constant 0 : index
    %c0_3 = arith.constant 0 : index
    %c0_4 = arith.constant 0 : index
    %1 = vector.load %arg2[%c0_2, %c0_3, %c0_4] : memref<1x8x128xf32, #tpu.memory_space<vmem>>, vector<1x8x128xf32>
    %2 = vector.shape_cast %1 : vector<1x8x128xf32> to vector<8x128xf32>
    %3 = vector.shape_cast %2 : vector<8x128xf32> to vector<1x8x128xf32>
    %4 = vector.broadcast %3 : vector<1x8x128xf32> to vector<2x8x128xf32>
    %5 = arith.addf %0, %4 : vector<2x8x128xf32>
    %c0_5 = arith.constant 0 : index
    %c0_6 = arith.constant 0 : index
    %c0_7 = arith.constant 0 : index
    %6 = vector.load %arg3[%c0_5, %c0_6, %c0_7] : memref<2x8x128xf32, #tpu.memory_space<vmem>>, vector<2x8x128xf32>
    tpu.vector_store %arg3[%c0_5, %c0_6, %c0_7], %5 {strides = array<i32>} : memref<2x8x128xf32, #tpu.memory_space<vmem>>, vector<2x8x128xf32>,
    return
  }
  func.func @transform_0(%arg0: i32) -> (i32, i32, i32) {
    %c0_i32 = arith.constant 0 : i32
    %c0_i32_0 = arith.constant 0 : i32
    %c0_i32_1 = arith.constant 0 : i32
    return %c0_i32, %arg0, %c0_i32_0 : i32, i32, i32
  }
  func.func @transform_1(%arg0: i32) -> (i32, i32, i32) {
    %c0_i32 = arith.constant 0 : i32
    %c0_i32_0 = arith.constant 0 : i32
    %c0_i32_1 = arith.constant 0 : i32
    return %c0_i32, %arg0, %c0_i32_0 : i32, i32, i32
  }
  func.func @transform_2(%arg0: i32) -> (i32, i32, i32) {
    %c0_i32 = arith.constant 0 : i32
    %c0_i32_0 = arith.constant 0 : i32
    %c0_i32_1 = arith.constant 0 : i32
    return %c0_i32, %arg0, %c0_i32_0 : i32, i32, i32
  }
}

</mosaic_0001>

<bundles_post_ra>
// kernel: tpu_custom_call.1
= control target key start
LH: loop header
LB: loop body
LE: loop exit
PB: predicated region body
PF: predicated region fallthrough
CT: control target
= control target key end

     0   :  { %7 = vsyncpa [#allocation3], 0  ;;  %s205_s0 = inlined_call_operand.hbm [shape: f32[2,8,128], index: 0, kind: input, shape index: {}]   ;;  %s206_s1 = inlined_call_operand.hbm [shape: f32[1,16,128], index: 1, kind: input, shape index: {}]   ;;  %s207_s2 = inlined_call_operand.hbm [shape: f32[2,8,128], index: 2, kind: output, shape index: {}]  }
   0x1   :  { %8 = vsyncpa [#allocation6], 0 }
   0x2   :  { %9 = vsyncpa [#allocation4], 0  ;;  %s140_s9 = smov [#allocation2]   ;;  %s68_s13 = scalar_lea.hbm %s205_s0, 256 }
   0x3   :  { %s15_s10 = sshll.u32 %s140_s9, 4  ;;  %p69_p0 = scmp.ne.s32.totalorder %s205_s0, %s68_s13  ;;  %s16_s10 = int_to_ptr.vmem [resolvable:$true] %s15_s10 }
   0x4   :  { %p72_p1 = scmp.lt.u32.totalorder %s68_s13, %s205_s0 }
   0x6   :  { %p74_p2 = pnand %p72_p1, %p69_p0 }
   0x8   :  { %77 = shalt.err (!%p74_p2)
}
   0x9   :  { %s78_s18 = scalar_lea.vmem %s16_s10, 256  ;;  %p83_p4 = scmp.lt.s32.totalorder %s16_s10, %s16_s10 }
   0xa   :  { %p79_p3 = scmp.ne.s32.totalorder %s16_s10, %s78_s18  ;;  %p84_p5 = scmp.lt.s32.totalorder %s78_s18, %s78_s18 }
   0xc   :  { %p85_p6 = por %p84_p5, %p83_p4 }
   0xe   :  { %p86_p7 = pnand %p85_p6, %p79_p3 }
  0x10   :  { %89 = shalt.err (!%p86_p7)
}
  0x11   :  { %s141_s19 = smov 128   ;;  %s142_s20 = smov 8  }
  0x12   :  { %21 = dma.hbm_to_vmem [thread:$0]  %s205_s0, 256, %s16_s10, [#allocation3], %s141_s19, %s141_s19, %s142_s20  }
  0x13   :  { %s143_s23 = smov [#allocation5]   ;;  %s90_s27 = scalar_lea.hbm %s206_s1, 128 }
  0x14   :  { %s28_s24 = sshll.u32 %s143_s23, 4  ;;  %p91_p8 = scmp.ne.s32.totalorder %s206_s1, %s90_s27  ;;  %s29_s24 = int_to_ptr.vmem [resolvable:$true] %s28_s24 }
  0x15   :  { %s92_s4 = scalar_lea.hbm %s206_s1, 256  ;;  %p94_p10 = scmp.lt.u32.totalorder %s90_s27, %s206_s1 }
  0x16   :  { %p93_p9 = scmp.lt.u32.totalorder %s92_s4, %s90_s27 }
  0x18   :  { %p95_p11 = por %p94_p10, %p93_p9 }
  0x1a   :  { %p96_p12 = pnand %p95_p11, %p91_p8 }
  0x1c   :  { %99 = shalt.err (!%p96_p12)
}
  0x1d   :  { %s100_s0 = scalar_lea.vmem %s29_s24, 128  ;;  %p105_p0 = scmp.lt.s32.totalorder %s29_s24, %s29_s24 }
  0x1e   :  { %p101_p13 = scmp.ne.s32.totalorder %s29_s24, %s100_s0  ;;  %p106_p1 = scmp.lt.s32.totalorder %s100_s0, %s100_s0 }
  0x20   :  { %p107_p2 = por %p106_p1, %p105_p0 }
  0x22   :  { %p108_p3 = pnand %p107_p2, %p101_p13 }
  0x24   :  { %111 = shalt.err (!%p108_p3)
}
  0x25   :  { %31 = dma.hbm_to_vmem [thread:$0]  %s206_s1, 128, %s29_s24, [#allocation6]  }
  0x26   :  { %134 = dma.done.wait [#allocation3], 256  }
  0x27   :  { %135 = vsyncadd [#allocation3], 4294967040 }
  0x28   :  { %136 = dma.done.wait [#allocation6], 128  }
  0x29   :  { %137 = vsyncadd [#allocation6], 4294967168  ;;  %s144_s9 = smov [#allocation7]   ;;  %v38_v0 = vld [vmem:[#allocation2] sm:$0xff]  ;;  %v40_v1 = vld [vmem:[#allocation5] sm:$0xff] }
  0x2a   :  { %s50_s10 = sshll.u32 %s144_s9, 4  ;;  %v39_v2 = vld [vmem:[#allocation2 + $0x8] sm:$0xff]  ;;  %v41_v3 = vadd.f32 %v40_v1, %v38_v0  ;;  %s51_s10 = int_to_ptr.vmem [resolvable:$true] %s50_s10 }
  0x2b   :  { %v42_v4 = vadd.f32 %v40_v1, %v39_v2  ;;  %s112_s11 = scalar_lea.vmem %s51_s10, 256  ;;  %p117_p5 = scmp.lt.s32.totalorder %s51_s10, %s51_s10 }
  0x2c   :  { %43 = vst [vmem:[#allocation7] sm:$0xff] %v41_v3  ;;  %p113_p4 = scmp.ne.s32.totalorder %s51_s10, %s112_s11  ;;  %p118_p6 = scmp.lt.s32.totalorder %s112_s11, %s112_s11 }
  0x2d   :  { %44 = vst [vmem:[#allocation7 + $0x8] sm:$0xff] %v42_v4 }
  0x2e   :  { %p119_p7 = por %p118_p6, %p117_p5 }
  0x30   :  { %p120_p8 = pnand %p119_p7, %p113_p4 }
  0x32   :  { %123 = shalt.err (!%p120_p8)
}
  0x33   :  { %s124_s13 = scalar_lea.hbm %s207_s2, 256 }
  0x34   :  { %p125_p9 = scmp.ne.s32.totalorder %s207_s2, %s124_s13  ;;  %p128_p10 = scmp.lt.u32.totalorder %s124_s13, %s207_s2 }
  0x36   :  { %p130_p11 = pnand %p128_p10, %p125_p9 }
  0x38   :  { %133 = shalt.err (!%p130_p11)
}
  0x39   :  { %56 = dma.vmem_to_hbm [thread:$0]  %s51_s10, 256, %s207_s2, [#allocation4], %s141_s19, %s141_s19, %s142_s20  }
  0x3a   :  { %138 = dma.done.wait [#allocation4], 256  }
  0x3b   :  { %139 = vsyncadd [#allocation4], 4294967040 }
  0x3c   :  { %60 = vsyncpa [#allocation3], 1 }
  0x3d   :  { %61 = vsyncpa [#allocation6], 1 }
  0x3e   :  { %62 = vsyncpa [#allocation4], 1 }

</bundles_post_ra>
